<compile_context>
chip_gen: v7x
topology: tpu7x:2x2x1
jax: 0.10.0
libtpu: 0.0.40
codegen_flags: <defaults>
</compile_context>

<pallas_src>
import functools

import jax
import jax.numpy as jnp
from jax.experimental import pallas as pl
from jax.experimental.pallas import tpu as pltpu


def _sigmoid_via_tanh(x):
    # One EUP push instead of exp + reciprocal.
    return 0.5 * (jnp.tanh(0.5 * x) + 1.0)


def _resident_spec(shape):
    """Full-array VMEM block with a constant index map: loaded once, stays
    resident across the whole T-step grid (no per-step re-DMA)."""
    zeros = (0,) * len(shape)
    return pl.BlockSpec(tuple(shape), lambda t, _z=zeros: _z)


# -----------------------------------------------------------------------------
# Kernel: one grid step == one decode timestep (embedding + L LSTM cells + FC)
# -----------------------------------------------------------------------------
def _decoder_kernel(num_layers, hidden_size, *refs):
    """refs = (x, emb, h0, c0, [w_ih_l, w_hh_l, b_l]*L, w_fc, b_fc,   # inputs
               preds_out, state_out,                                   # outputs
               h_scr, c_scr)                                           # scratch

    x:         (1, N, 1) int32 token ids for the current timestep
    emb:       (V_pad, E) bf16 embedding table (resident)
    h0, c0:    (L, N, H) f32 initial state (resident, read only at t == 0)
    w_ih_l:    (in_l, 4H) bf16 ; w_hh_l: (H, 4H) bf16 ; b_l: (1, 4H) f32
    w_fc:      (H, OUT_PAD) bf16 ; b_fc: (1, OUT_PAD) f32
    preds_out: (1, N, OUT_PAD) f32 per-step block
    state_out: (L, N, 2H) f32 packed [h | c] slab, written at the last step
    h_scr/c_scr: (L, N, H) f32 VMEM scratch — recurrent carry across steps
    """
    x_ref, emb_ref, h0_ref, c0_ref = refs[0:4]
    layer_refs = refs[4:4 + 3 * num_layers]
    w_fc_ref, b_fc_ref = refs[4 + 3 * num_layers:6 + 3 * num_layers]
    preds_ref, state_ref = refs[6 + 3 * num_layers:8 + 3 * num_layers]
    h_scr, c_scr = refs[8 + 3 * num_layers:]

    hid = hidden_size
    t = pl.program_id(0)

    @pl.when(t == 0)
    def _init():
        h_scr[...] = h0_ref[...]
        c_scr[...] = c0_ref[...]

    # Embedding gather as a one-hot @ table MXU matmul (table stays in VMEM).
    # TODO(synk): for realistic vocab sizes keep the table in HBM (pl.ANY) and
    # gather rows via DMA instead of an O(N*V) one-hot (v7x has 64 MiB VMEM).
    ids = x_ref[0]                                           # (N, 1) int32
    n = ids.shape[0]
    vocab = emb_ref.shape[0]
    one_hot = (ids == jax.lax.broadcasted_iota(jnp.int32, (n, vocab), 1)
               ).astype(jnp.float32).astype(jnp.bfloat16)    # exact 0/1 in bf16
    inp = jnp.dot(one_hot, emb_ref[...],
                  preferred_element_type=jnp.float32)        # (N, E) f32
    # TODO(synk): nn.Dropout (embedding + inter-layer) is identity here
    # (inference semantics); training-mode dropout masks are not applied.

    for layer in range(num_layers):                          # unrolled
        w_ih = layer_refs[3 * layer][...]                    # (in_l, 4H) bf16
        w_hh = layer_refs[3 * layer + 1][...]                # (H, 4H)  bf16
        b = layer_refs[3 * layer + 2][...]                   # (1, 4H)  f32
        h_prev = h_scr[layer]                                # (N, H) f32
        c_prev = c_scr[layer]                                # (N, H) f32

        # No lane concat: two MXU pushes + VPU add, f32 accumulation.
        gates = (jnp.dot(inp.astype(jnp.bfloat16), w_ih,
                         preferred_element_type=jnp.float32)
                 + jnp.dot(h_prev.astype(jnp.bfloat16), w_hh,
                           preferred_element_type=jnp.float32)
                 + b)                                        # (N, 4H) f32

        # Whole-block EUP pushes, then static half-lane gate picks (i, f, g, o).
        sig_all = _sigmoid_via_tanh(gates)
        tanh_all = jnp.tanh(gates)
        i_g = sig_all[:, 0 * hid:1 * hid]
        f_g = sig_all[:, 1 * hid:2 * hid]
        g_g = tanh_all[:, 2 * hid:3 * hid]
        o_g = sig_all[:, 3 * hid:4 * hid]

        c_new = f_g * c_prev + i_g * g_g
        h_new = o_g * jnp.tanh(c_new)

        h_scr[layer] = h_new
        c_scr[layer] = c_new
        inp = h_new                                          # inter-layer dropout = id

    # FC head, lane-dense (N, OUT_PAD) = (8, 128) unmasked store per step.
    preds_ref[0] = (jnp.dot(inp.astype(jnp.bfloat16), w_fc_ref[...],
                            preferred_element_type=jnp.float32)
                    + b_fc_ref[...])

    @pl.when(t == pl.num_programs(0) - 1)
    def _finalize():
        for layer in range(num_layers):
            # Lane-dense (N, 2H) = (8, 128) packed [h | c] slab, written once.
            state_ref[layer] = jnp.concatenate(
                [h_scr[layer], c_scr[layer]], axis=-1)


# -----------------------------------------------------------------------------
# Wrappers
# -----------------------------------------------------------------------------
def decoder_decode(params, tokens, hidden, cell, *, num_layers, output_size):
    """tokens: (T, N) int32; hidden, cell: (L, N, H) f32.
    Returns (preds (T, N, output_size), h_T, c_T) — T fused decode steps in one
    pallas_call (teacher-forced token stream)."""
    t_steps, n = tokens.shape
    _, _, hid = hidden.shape
    out_pad = params["w_fc"].shape[1]
    tokens3d = tokens.astype(jnp.int32).reshape(t_steps, n, 1)

    args = [tokens3d, params["embedding"], hidden, cell]
    in_specs = [
        pl.BlockSpec((1, n, 1), lambda t: (t, 0, 0)),   # per-step token ids
        _resident_spec(params["embedding"].shape),
        _resident_spec(hidden.shape),
        _resident_spec(cell.shape),
    ]
    for layer in range(num_layers):
        for name in (f"w_ih_{layer}", f"w_hh_{layer}", f"b_{layer}"):
            arr = params[name]
            args.append(arr)
            in_specs.append(_resident_spec(arr.shape))
    for name in ("w_fc", "b_fc"):
        arr = params[name]
        args.append(arr)
        in_specs.append(_resident_spec(arr.shape))

    # Advisory cost estimate (lets XLA overlap neighbours with the weight DMA).
    vocab, emb_dim = params["embedding"].shape
    flops_step = 2 * n * vocab * emb_dim
    trans_step = 0
    in_dim = emb_dim
    for _ in range(num_layers):
        flops_step += 2 * n * in_dim * 4 * hid + 2 * n * hid * 4 * hid
        trans_step += n * (4 * hid + hid)
        in_dim = hid
    flops_step += 2 * n * hid * out_pad
    weight_bytes = sum(int(a.size) * a.dtype.itemsize for a in args[1:])
    bytes_accessed = (weight_bytes + int(tokens3d.size) * 4
                      + t_steps * n * out_pad * 4 + num_layers * n * 2 * hid * 4)
    cost = pl.CostEstimate(flops=int(t_steps * flops_step),
                           transcendentals=int(t_steps * trans_step),
                           bytes_accessed=int(bytes_accessed))

    kernel = functools.partial(_decoder_kernel, num_layers, hid)

    preds_pad, state = pl.pallas_call(
        kernel,
        out_shape=(
            jax.ShapeDtypeStruct((t_steps, n, out_pad), jnp.float32),
            jax.ShapeDtypeStruct((num_layers, n, 2 * hid), jnp.float32),
        ),
        grid_spec=pltpu.PrefetchScalarGridSpec(
            num_scalar_prefetch=0,
            grid=(t_steps,),
            in_specs=in_specs,
            out_specs=(
                pl.BlockSpec((1, n, out_pad), lambda t: (t, 0, 0)),
                pl.BlockSpec((num_layers, n, 2 * hid), lambda t: (0, 0, 0)),
            ),
            scratch_shapes=[pltpu.VMEM((num_layers, n, hid), jnp.float32),
                            pltpu.VMEM((num_layers, n, hid), jnp.float32)],
        ),
        compiler_params=pltpu.CompilerParams(
            dimension_semantics=("arbitrary",)),   # state carries across steps
        cost_estimate=cost,
    )(*args)

    preds = preds_pad[:, :, :output_size]
    new_h = state[:, :, :hid]          # unpack packed [h|c] slab ONCE per decode
    new_c = state[:, :, hid:]
    return preds, new_h, new_c


def decoder_forward(params, x, hidden, cell, *, num_layers, output_size):
    """Single decode step — exact semantics of the PyTorch Decoder.forward."""
    preds, new_h, new_c = decoder_decode(
        params, x.reshape(1, -1), hidden, cell,
        num_layers=num_layers, output_size=output_size)
    return preds[0], new_h, new_c


# -----------------------------------------------------------------------------
# Parameter init (deterministic; mirrors the PyTorch module's shapes)
# -----------------------------------------------------------------------------
def init_decoder_params(key, input_size, embedding_size, hidden_size,
                        output_size, num_layers):
    params = {}
    bound = 1.0 / float(hidden_size) ** 0.5
    keys = jax.random.split(key, 1 + 4 * num_layers + 2)
    k = iter(range(len(keys)))

    # nn.Embedding(input_size, embedding_size): weight ~ N(0, 1).  Vocab rows
    # padded to a multiple of 16 (bf16 sublane tile); padded rows never match.
    v_pad = ((input_size + 15) // 16) * 16
    emb = jax.random.normal(keys[next(k)], (input_size, embedding_size),
                            jnp.float32)
    params["embedding"] = jnp.pad(
        emb, ((0, v_pad - input_size), (0, 0))).astype(jnp.bfloat16)

    # nn.LSTM(embedding_size, hidden_size, num_layers), gate order (i, f, g, o).
    # NOTE: torch stores weight_ih_l{k} as (4H, in); here weights are kept
    # transposed (in, 4H) and in bf16 — real checkpoints must be transposed.
    for layer in range(num_layers):
        in_dim = embedding_size if layer == 0 else hidden_size
        w_ih = jax.random.uniform(keys[next(k)], (in_dim, 4 * hidden_size),
                                  jnp.float32, -bound, bound)
        w_hh = jax.random.uniform(keys[next(k)], (hidden_size, 4 * hidden_size),
                                  jnp.float32, -bound, bound)
        b_ih = jax.random.uniform(keys[next(k)], (1, 4 * hidden_size),
                                  jnp.float32, -bound, bound)
        b_hh = jax.random.uniform(keys[next(k)], (1, 4 * hidden_size),
                                  jnp.float32, -bound, bound)
        params[f"w_ih_{layer}"] = w_ih.astype(jnp.bfloat16)
        params[f"w_hh_{layer}"] = w_hh.astype(jnp.bfloat16)
        params[f"b_{layer}"] = b_ih + b_hh          # folded bias, kept f32

    # nn.Linear(hidden_size, output_size), padded to a 128-lane-dense width.
    out_pad = ((output_size + 127) // 128) * 128
    w_fc = jax.random.uniform(keys[next(k)], (hidden_size, output_size),
                              jnp.float32, -bound, bound)
    b_fc = jax.random.uniform(keys[next(k)], (1, output_size),
                              jnp.float32, -bound, bound)
    params["w_fc"] = jnp.pad(
        w_fc, ((0, 0), (0, out_pad - output_size))).astype(jnp.bfloat16)
    params["b_fc"] = jnp.pad(b_fc, ((0, 0), (0, out_pad - output_size)))
    return params


# -----------------------------------------------------------------------------
# Pure-JAX reference (standard sigmoid; same bf16 matmul operands) for checking
# -----------------------------------------------------------------------------
def reference_decode(params, tokens, hidden, cell, num_layers, output_size):
    hid = hidden.shape[-1]
    h, c = hidden, cell
    preds = []
    for t in range(tokens.shape[0]):
        inp = jnp.take(params["embedding"], tokens[t], axis=0).astype(jnp.float32)
        for layer in range(num_layers):
            gates = (jnp.dot(inp.astype(jnp.bfloat16), params[f"w_ih_{layer}"],
                             preferred_element_type=jnp.float32)
                     + jnp.dot(h[layer].astype(jnp.bfloat16),
                               params[f"w_hh_{layer}"],
                               preferred_element_type=jnp.float32)
                     + params[f"b_{layer}"])
            i_g = jax.nn.sigmoid(gates[:, :hid])
            f_g = jax.nn.sigmoid(gates[:, hid:2 * hid])
            g_g = jnp.tanh(gates[:, 2 * hid:3 * hid])
            o_g = jax.nn.sigmoid(gates[:, 3 * hid:])
            c_new = f_g * c[layer] + i_g * g_g
            h_new = o_g * jnp.tanh(c_new)
            h = h.at[layer].set(h_new)
            c = c.at[layer].set(c_new)
            inp = h_new
        p = (jnp.dot(inp.astype(jnp.bfloat16), params["w_fc"],
                     preferred_element_type=jnp.float32)
             + params["b_fc"])[:, :output_size]
        preds.append(p)
    return jnp.stack(preds), h, c


if __name__ == "__main__":
    INPUT_SIZE = 40       # vocab size
    EMBEDDING_SIZE = 32
    HIDDEN_SIZE = 64
    OUTPUT_SIZE = 40
    NUM_LAYERS = 2
    DROPOUT = 0.0         # identity at inference
    BATCH = 8
    T_STEPS = 6

    key = jax.random.PRNGKey(0)
    kp, kx, kh, kc = jax.random.split(key, 4)

    params = init_decoder_params(kp, INPUT_SIZE, EMBEDDING_SIZE, HIDDEN_SIZE,
                                 OUTPUT_SIZE, NUM_LAYERS)
    tokens = jax.random.randint(kx, (T_STEPS, BATCH), 0, INPUT_SIZE,
                                dtype=jnp.int32)
    hidden = jax.random.normal(kh, (NUM_LAYERS, BATCH, HIDDEN_SIZE), jnp.float32)
    cell = jax.random.normal(kc, (NUM_LAYERS, BATCH, HIDDEN_SIZE), jnp.float32)

    step_fn = jax.jit(functools.partial(decoder_forward, num_layers=NUM_LAYERS,
                                        output_size=OUTPUT_SIZE))
    decode_fn = jax.jit(functools.partial(decoder_decode, num_layers=NUM_LAYERS,
                                          output_size=OUTPUT_SIZE))

    # --- Single-step forward: exact PyTorch Decoder.forward semantics ---
    p1, h1, c1 = jax.block_until_ready(step_fn(params, tokens[0], hidden, cell))
    assert p1.shape == (BATCH, OUTPUT_SIZE)
    assert h1.shape == (NUM_LAYERS, BATCH, HIDDEN_SIZE)
    assert c1.shape == (NUM_LAYERS, BATCH, HIDDEN_SIZE)
    rp1, rh1, rc1 = reference_decode(params, tokens[:1], hidden, cell,
                                     NUM_LAYERS, OUTPUT_SIZE)
    assert jnp.allclose(p1, rp1[0], rtol=2e-2, atol=2e-2)
    assert jnp.allclose(h1, rh1, rtol=2e-2, atol=2e-2)
    assert jnp.allclose(c1, rc1, rtol=2e-2, atol=2e-2)

    # --- Multi-step fused decode: T steps in one pallas_call ---
    pT, hT, cT = jax.block_until_ready(decode_fn(params, tokens, hidden, cell))
    assert pT.shape == (T_STEPS, BATCH, OUTPUT_SIZE)
    rpT, rhT, rcT = reference_decode(params, tokens, hidden, cell,
                                     NUM_LAYERS, OUTPUT_SIZE)
    assert jnp.allclose(pT, rpT, rtol=2e-2, atol=2e-2)
    assert jnp.allclose(hT, rhT, rtol=2e-2, atol=2e-2)
    assert jnp.allclose(cT, rcT, rtol=2e-2, atol=2e-2)

    print("KERNEL_OK")
</pallas_src>

<mosaic_0001>
module attributes {stable_mosaic.version = 11 : i64} {
  func.func @_decoder_kernel(%arg0: i32, %arg1: memref<1x8x1xi32, #tpu.memory_space<vmem>>, %arg2: memref<48x32xbf16, #tpu.memory_space<vmem>>, %arg3: memref<2x8x64xf32, #tpu.memory_space<vmem>>, %arg4: memref<2x8x64xf32, #tpu.memory_space<vmem>>, %arg5: memref<32x256xbf16, #tpu.memory_space<vmem>>, %arg6: memref<64x256xbf16, #tpu.memory_space<vmem>>, %arg7: memref<1x256xf32, #tpu.memory_space<vmem>>, %arg8: memref<64x256xbf16, #tpu.memory_space<vmem>>, %arg9: memref<64x256xbf16, #tpu.memory_space<vmem>>, %arg10: memref<1x256xf32, #tpu.memory_space<vmem>>, %arg11: memref<64x128xbf16, #tpu.memory_space<vmem>>, %arg12: memref<1x128xf32, #tpu.memory_space<vmem>>, %arg13: memref<1x8x128xf32, #tpu.memory_space<vmem>>, %arg14: memref<2x8x128xf32, #tpu.memory_space<vmem>>, %arg15: memref<2x8x64xf32, #tpu.memory_space<vmem>>, %arg16: memref<2x8x64xf32, #tpu.memory_space<vmem>>) attributes {dimension_semantics = [#tpu.dimension_semantics<arbitrary>], iteration_bounds = array<i64: 1>, scalar_prefetch = 0 : i64, scratch_operands = 2 : i64, tpu.core_type = #tpu.core_type<tc>, window_params = [{transform_indices = @transform_0, window_bounds = array<i64: 1, 8, 1>}, {pipeline_mode = #tpu.pipeline_mode<synchronous>, transform_indices = @transform_1, window_bounds = array<i64: 48, 32>}, {pipeline_mode = #tpu.pipeline_mode<synchronous>, transform_indices = @transform_2, window_bounds = array<i64: 2, 8, 64>}, {pipeline_mode = #tpu.pipeline_mode<synchronous>, transform_indices = @transform_3, window_bounds = array<i64: 2, 8, 64>}, {pipeline_mode = #tpu.pipeline_mode<synchronous>, transform_indices = @transform_4, window_bounds = array<i64: 32, 256>}, {pipeline_mode = #tpu.pipeline_mode<synchronous>, transform_indices = @transform_5, window_bounds = array<i64: 64, 256>}, {pipeline_mode = #tpu.pipeline_mode<synchronous>, transform_indices = @transform_6, window_bounds = array<i64: 1, 256>}, {pipeline_mode = #tpu.pipeline_mode<synchronous>, transform_indices = @transform_7, window_bounds = array<i64: 64, 256>}, {pipeline_mode = #tpu.pipeline_mode<synchronous>, transform_indices = @transform_8, window_bounds = array<i64: 64, 256>}, {pipeline_mode = #tpu.pipeline_mode<synchronous>, transform_indices = @transform_9, window_bounds = array<i64: 1, 256>}, {pipeline_mode = #tpu.pipeline_mode<synchronous>, transform_indices = @transform_10, window_bounds = array<i64: 64, 128>}, {pipeline_mode = #tpu.pipeline_mode<synchronous>, transform_indices = @transform_11, window_bounds = array<i64: 1, 128>}, {transform_indices = @transform_12, window_bounds = array<i64: 1, 8, 128>}, {pipeline_mode = #tpu.pipeline_mode<synchronous>, transform_indices = @transform_13, window_bounds = array<i64: 2, 8, 128>}]} {
    %c0_i32 = arith.constant 0 : i32
    %0 = arith.cmpi eq, %arg0, %c0_i32 : i32
    %1 = arith.extui %0 : i1 to i32
    %c0_i32_0 = arith.constant 0 : i32
    %2 = arith.cmpi ne, %1, %c0_i32_0 : i32
    scf.if %2 {
      %c0_60 = arith.constant 0 : index
      %c0_61 = arith.constant 0 : index
      %c0_62 = arith.constant 0 : index
      %99 = vector.load %arg3[%c0_60, %c0_61, %c0_62] : memref<2x8x64xf32, #tpu.memory_space<vmem>>, vector<2x8x64xf32>
      %c0_63 = arith.constant 0 : index
      %c0_64 = arith.constant 0 : index
      %c0_65 = arith.constant 0 : index
      %100 = vector.load %arg15[%c0_63, %c0_64, %c0_65] : memref<2x8x64xf32, #tpu.memory_space<vmem>>, vector<2x8x64xf32>
      tpu.vector_store %arg15[%c0_63, %c0_64, %c0_65], %99 {strides = array<i32>} : memref<2x8x64xf32, #tpu.memory_space<vmem>>, vector<2x8x64xf32>,
      %c0_66 = arith.constant 0 : index
      %c0_67 = arith.constant 0 : index
      %c0_68 = arith.constant 0 : index
      %101 = vector.load %arg4[%c0_66, %c0_67, %c0_68] : memref<2x8x64xf32, #tpu.memory_space<vmem>>, vector<2x8x64xf32>
      %c0_69 = arith.constant 0 : index
      %c0_70 = arith.constant 0 : index
      %c0_71 = arith.constant 0 : index
      %102 = vector.load %arg16[%c0_69, %c0_70, %c0_71] : memref<2x8x64xf32, #tpu.memory_space<vmem>>, vector<2x8x64xf32>
      tpu.vector_store %arg16[%c0_69, %c0_70, %c0_71], %101 {strides = array<i32>} : memref<2x8x64xf32, #tpu.memory_space<vmem>>, vector<2x8x64xf32>,
    } else {
    }
    %c0 = arith.constant 0 : index
    %c0_1 = arith.constant 0 : index
    %c0_2 = arith.constant 0 : index
    %3 = vector.load %arg1[%c0, %c0_1, %c0_2] : memref<1x8x1xi32, #tpu.memory_space<vmem>>, vector<1x8x1xi32>
    %4 = vector.shape_cast %3 : vector<1x8x1xi32> to vector<8x1xi32>
    %5 = tpu.iota {dimensions = array<i32: 1>} : vector<8x48xi32>
    %6 = vector.broadcast %4 : vector<8x1xi32> to vector<8x48xi32>
    %7 = arith.cmpi eq, %6, %5 : vector<8x48xi32>
    %8 = arith.extui %7 : vector<8x48xi1> to vector<8x48xi32>
    %9 = arith.sitofp %8 : vector<8x48xi32> to vector<8x48xf32>
    %10 = arith.truncf %9 : vector<8x48xf32> to vector<8x48xbf16>
    %c0_3 = arith.constant 0 : index
    %c0_4 = arith.constant 0 : index
    %11 = vector.load %arg2[%c0_3, %c0_4] : memref<48x32xbf16, #tpu.memory_space<vmem>>, vector<48x32xbf16>
    %cst = arith.constant dense<0.000000e+00> : vector<8x32xf32>
    %12 = tpu.matmul %10, %11, %cst {dimension_numbers = #tpu.dot_dimension_numbers<[1], [0], [0], [1], [0, 0, 1, 1], [], []>} : vector<8x48xbf16>, vector<48x32xbf16>, vector<8x32xf32> -> vector<8x32xf32>
    %c0_5 = arith.constant 0 : index
    %c0_6 = arith.constant 0 : index
    %13 = vector.load %arg5[%c0_5, %c0_6] : memref<32x256xbf16, #tpu.memory_space<vmem>>, vector<32x256xbf16>
    %c0_7 = arith.constant 0 : index
    %c0_8 = arith.constant 0 : index
    %14 = vector.load %arg6[%c0_7, %c0_8] : memref<64x256xbf16, #tpu.memory_space<vmem>>, vector<64x256xbf16>
    %c0_9 = arith.constant 0 : index
    %c0_10 = arith.constant 0 : index
    %15 = vector.load %arg7[%c0_9, %c0_10] : memref<1x256xf32, #tpu.memory_space<vmem>>, vector<1x256xf32>
    %c0_11 = arith.constant 0 : index
    %c0_12 = arith.constant 0 : index
    %c0_13 = arith.constant 0 : index
    %16 = vector.load %arg15[%c0_11, %c0_12, %c0_13] : memref<2x8x64xf32, #tpu.memory_space<vmem>>, vector<1x8x64xf32>
    %17 = vector.shape_cast %16 : vector<1x8x64xf32> to vector<8x64xf32>
    %c0_14 = arith.constant 0 : index
    %c0_15 = arith.constant 0 : index
    %c0_16 = arith.constant 0 : index
    %18 = vector.load %arg16[%c0_14, %c0_15, %c0_16] : memref<2x8x64xf32, #tpu.memory_space<vmem>>, vector<1x8x64xf32>
    %19 = vector.shape_cast %18 : vector<1x8x64xf32> to vector<8x64xf32>
    %20 = arith.truncf %12 : vector<8x32xf32> to vector<8x32xbf16>
    %cst_17 = arith.constant dense<0.000000e+00> : vector<8x256xf32>
    %21 = tpu.matmul %20, %13, %cst_17 {dimension_numbers = #tpu.dot_dimension_numbers<[1], [0], [0], [1], [0, 0, 1, 1], [], []>} : vector<8x32xbf16>, vector<32x256xbf16>, vector<8x256xf32> -> vector<8x256xf32>
    %22 = arith.truncf %17 : vector<8x64xf32> to vector<8x64xbf16>
    %cst_18 = arith.constant dense<0.000000e+00> : vector<8x256xf32>
    %23 = tpu.matmul %22, %14, %cst_18 {dimension_numbers = #tpu.dot_dimension_numbers<[1], [0], [0], [1], [0, 0, 1, 1], [], []>} : vector<8x64xbf16>, vector<64x256xbf16>, vector<8x256xf32> -> vector<8x256xf32>
    %24 = arith.addf %21, %23 : vector<8x256xf32>
    %25 = vector.broadcast %15 : vector<1x256xf32> to vector<8x256xf32>
    %26 = arith.addf %24, %25 : vector<8x256xf32>
    %cst_19 = arith.constant 5.000000e-01 : f32
    %27 = vector.broadcast %cst_19 : f32 to vector<8x256xf32>
    %28 = arith.mulf %27, %26 : vector<8x256xf32>
    %29 = math.tanh %28 : vector<8x256xf32>
    %cst_20 = arith.constant 1.000000e+00 : f32
    %30 = vector.broadcast %cst_20 : f32 to vector<8x256xf32>
    %31 = arith.addf %29, %30 : vector<8x256xf32>
    %cst_21 = arith.constant 5.000000e-01 : f32
    %32 = vector.broadcast %cst_21 : f32 to vector<8x256xf32>
    %33 = arith.mulf %32, %31 : vector<8x256xf32>
    %34 = math.tanh %26 : vector<8x256xf32>
    %35 = vector.extract_strided_slice %33 {offsets = [0, 0], sizes = [8, 64], strides = [1, 1]} : vector<8x256xf32> to vector<8x64xf32>
    %36 = vector.extract_strided_slice %33 {offsets = [0, 64], sizes = [8, 64], strides = [1, 1]} : vector<8x256xf32> to vector<8x64xf32>
    %37 = vector.extract_strided_slice %34 {offsets = [0, 128], sizes = [8, 64], strides = [1, 1]} : vector<8x256xf32> to vector<8x64xf32>
    %38 = vector.extract_strided_slice %33 {offsets = [0, 192], sizes = [8, 64], strides = [1, 1]} : vector<8x256xf32> to vector<8x64xf32>
    %39 = arith.mulf %36, %19 : vector<8x64xf32>
    %40 = arith.mulf %35, %37 : vector<8x64xf32>
    %41 = arith.addf %39, %40 : vector<8x64xf32>
    %42 = math.tanh %41 : vector<8x64xf32>
    %43 = arith.mulf %38, %42 : vector<8x64xf32>
    %c0_22 = arith.constant 0 : index
    %c0_23 = arith.constant 0 : index
    %c0_24 = arith.constant 0 : index
    %44 = vector.load %arg15[%c0_22, %c0_23, %c0_24] : memref<2x8x64xf32, #tpu.memory_space<vmem>>, vector<1x8x64xf32>
    %45 = vector.shape_cast %44 : vector<1x8x64xf32> to vector<8x64xf32>
    %46 = vector.shape_cast %43 : vector<8x64xf32> to vector<1x8x64xf32>
    tpu.vector_store %arg15[%c0_22, %c0_23, %c0_24], %46 {strides = array<i32>} : memref<2x8x64xf32, #tpu.memory_space<vmem>>, vector<1x8x64xf32>,
    %c0_25 = arith.constant 0 : index
    %c0_26 = arith.constant 0 : index
    %c0_27 = arith.constant 0 : index
    %47 = vector.load %arg16[%c0_25, %c0_26, %c0_27] : memref<2x8x64xf32, #tpu.memory_space<vmem>>, vector<1x8x64xf32>
    %48 = vector.shape_cast %47 : vector<1x8x64xf32> to vector<8x64xf32>
    %49 = vector.shape_cast %41 : vector<8x64xf32> to vector<1x8x64xf32>
    tpu.vector_store %arg16[%c0_25, %c0_26, %c0_27], %49 {strides = array<i32>} : memref<2x8x64xf32, #tpu.memory_space<vmem>>, vector<1x8x64xf32>,
    %c0_28 = arith.constant 0 : index
    %c0_29 = arith.constant 0 : index
    %50 = vector.load %arg8[%c0_28, %c0_29] : memref<64x256xbf16, #tpu.memory_space<vmem>>, vector<64x256xbf16>
    %c0_30 = arith.constant 0 : index
    %c0_31 = arith.constant 0 : index
    %51 = vector.load %arg9[%c0_30, %c0_31] : memref<64x256xbf16, #tpu.memory_space<vmem>>, vector<64x256xbf16>
    %c0_32 = arith.constant 0 : index
    %c0_33 = arith.constant 0 : index
    %52 = vector.load %arg10[%c0_32, %c0_33] : memref<1x256xf32, #tpu.memory_space<vmem>>, vector<1x256xf32>
    %c1 = arith.constant 1 : index
    %c0_34 = arith.constant 0 : index
    %c0_35 = arith.constant 0 : index
    %53 = vector.load %arg15[%c1, %c0_34, %c0_35] : memref<2x8x64xf32, #tpu.memory_space<vmem>>, vector<1x8x64xf32>
    %54 = vector.shape_cast %53 : vector<1x8x64xf32> to vector<8x64xf32>
    %c1_36 = arith.constant 1 : index
    %c0_37 = arith.constant 0 : index
    %c0_38 = arith.constant 0 : index
    %55 = vector.load %arg16[%c1_36, %c0_37, %c0_38] : memref<2x8x64xf32, #tpu.memory_space<vmem>>, vector<1x8x64xf32>
    %56 = vector.shape_cast %55 : vector<1x8x64xf32> to vector<8x64xf32>
    %57 = arith.truncf %43 : vector<8x64xf32> to vector<8x64xbf16>
    %cst_39 = arith.constant dense<0.000000e+00> : vector<8x256xf32>
    %58 = tpu.matmul %57, %50, %cst_39 {dimension_numbers = #tpu.dot_dimension_numbers<[1], [0], [0], [1], [0, 0, 1, 1], [], []>} : vector<8x64xbf16>, vector<64x256xbf16>, vector<8x256xf32> -> vector<8x256xf32>
    %59 = arith.truncf %54 : vector<8x64xf32> to vector<8x64xbf16>
    %cst_40 = arith.constant dense<0.000000e+00> : vector<8x256xf32>
    %60 = tpu.matmul %59, %51, %cst_40 {dimension_numbers = #tpu.dot_dimension_numbers<[1], [0], [0], [1], [0, 0, 1, 1], [], []>} : vector<8x64xbf16>, vector<64x256xbf16>, vector<8x256xf32> -> vector<8x256xf32>
    %61 = arith.addf %58, %60 : vector<8x256xf32>
    %62 = vector.broadcast %52 : vector<1x256xf32> to vector<8x256xf32>
    %63 = arith.addf %61, %62 : vector<8x256xf32>
    %cst_41 = arith.constant 5.000000e-01 : f32
    %64 = vector.broadcast %cst_41 : f32 to vector<8x256xf32>
    %65 = arith.mulf %64, %63 : vector<8x256xf32>
    %66 = math.tanh %65 : vector<8x256xf32>
    %cst_42 = arith.constant 1.000000e+00 : f32
    %67 = vector.broadcast %cst_42 : f32 to vector<8x256xf32>
    %68 = arith.addf %66, %67 : vector<8x256xf32>
    %cst_43 = arith.constant 5.000000e-01 : f32
    %69 = vector.broadcast %cst_43 : f32 to vector<8x256xf32>
    %70 = arith.mulf %69, %68 : vector<8x256xf32>
    %71 = math.tanh %63 : vector<8x256xf32>
    %72 = vector.extract_strided_slice %70 {offsets = [0, 0], sizes = [8, 64], strides = [1, 1]} : vector<8x256xf32> to vector<8x64xf32>
    %73 = vector.extract_strided_slice %70 {offsets = [0, 64], sizes = [8, 64], strides = [1, 1]} : vector<8x256xf32> to vector<8x64xf32>
    %74 = vector.extract_strided_slice %71 {offsets = [0, 128], sizes = [8, 64], strides = [1, 1]} : vector<8x256xf32> to vector<8x64xf32>
    %75 = vector.extract_strided_slice %70 {offsets = [0, 192], sizes = [8, 64], strides = [1, 1]} : vector<8x256xf32> to vector<8x64xf32>
    %76 = arith.mulf %73, %56 : vector<8x64xf32>
    %77 = arith.mulf %72, %74 : vector<8x64xf32>
    %78 = arith.addf %76, %77 : vector<8x64xf32>
    %79 = math.tanh %78 : vector<8x64xf32>
    %80 = arith.mulf %75, %79 : vector<8x64xf32>
    %c1_44 = arith.constant 1 : index
    %c0_45 = arith.constant 0 : index
    %c0_46 = arith.constant 0 : index
    %81 = vector.load %arg15[%c1_44, %c0_45, %c0_46] : memref<2x8x64xf32, #tpu.memory_space<vmem>>, vector<1x8x64xf32>
    %82 = vector.shape_cast %81 : vector<1x8x64xf32> to vector<8x64xf32>
    %83 = vector.shape_cast %80 : vector<8x64xf32> to vector<1x8x64xf32>
    tpu.vector_store %arg15[%c1_44, %c0_45, %c0_46], %83 {strides = array<i32>} : memref<2x8x64xf32, #tpu.memory_space<vmem>>, vector<1x8x64xf32>,
    %c1_47 = arith.constant 1 : index
    %c0_48 = arith.constant 0 : index
    %c0_49 = arith.constant 0 : index
    %84 = vector.load %arg16[%c1_47, %c0_48, %c0_49] : memref<2x8x64xf32, #tpu.memory_space<vmem>>, vector<1x8x64xf32>
    %85 = vector.shape_cast %84 : vector<1x8x64xf32> to vector<8x64xf32>
    %86 = vector.shape_cast %78 : vector<8x64xf32> to vector<1x8x64xf32>
    tpu.vector_store %arg16[%c1_47, %c0_48, %c0_49], %86 {strides = array<i32>} : memref<2x8x64xf32, #tpu.memory_space<vmem>>, vector<1x8x64xf32>,
    %87 = arith.truncf %80 : vector<8x64xf32> to vector<8x64xbf16>
    %c0_50 = arith.constant 0 : index
    %c0_51 = arith.constant 0 : index
    %88 = vector.load %arg11[%c0_50, %c0_51] : memref<64x128xbf16, #tpu.memory_space<vmem>>, vector<64x128xbf16>
    %cst_52 = arith.constant dense<0.000000e+00> : vector<8x128xf32>
    %89 = tpu.matmul %87, %88, %cst_52 {dimension_numbers = #tpu.dot_dimension_numbers<[1], [0], [0], [1], [0, 0, 1, 1], [], []>} : vector<8x64xbf16>, vector<64x128xbf16>, vector<8x128xf32> -> vector<8x128xf32>
    %c0_53 = arith.constant 0 : index
    %c0_54 = arith.constant 0 : index
    %90 = vector.load %arg12[%c0_53, %c0_54] : memref<1x128xf32, #tpu.memory_space<vmem>>, vector<1x128xf32>
    %91 = vector.broadcast %90 : vector<1x128xf32> to vector<8x128xf32>
    %92 = arith.addf %89, %91 : vector<8x128xf32>
    %c0_55 = arith.constant 0 : index
    %c0_56 = arith.constant 0 : index
    %c0_57 = arith.constant 0 : index
    %93 = vector.load %arg13[%c0_55, %c0_56, %c0_57] : memref<1x8x128xf32, #tpu.memory_space<vmem>>, vector<1x8x128xf32>
    %94 = vector.shape_cast %93 : vector<1x8x128xf32> to vector<8x128xf32>
    %95 = vector.shape_cast %92 : vector<8x128xf32> to vector<1x8x128xf32>
    tpu.vector_store %arg13[%c0_55, %c0_56, %c0_57], %95 {strides = array<i32>} : memref<1x8x128xf32, #tpu.memory_space<vmem>>, vector<1x8x128xf32>,
    %c0_i32_58 = arith.constant 0 : i32
    %96 = arith.cmpi eq, %arg0, %c0_i32_58 : i32
    %97 = arith.extui %96 : i1 to i32
    %c0_i32_59 = arith.constant 0 : i32
    %98 = arith.cmpi ne, %97, %c0_i32_59 : i32
    scf.if %98 {
      %c0_60 = arith.constant 0 : index
      %c0_61 = arith.constant 0 : index
      %c0_62 = arith.constant 0 : index
      %99 = vector.load %arg15[%c0_60, %c0_61, %c0_62] : memref<2x8x64xf32, #tpu.memory_space<vmem>>, vector<1x8x64xf32>
      %100 = vector.shape_cast %99 : vector<1x8x64xf32> to vector<8x64xf32>
      %c0_63 = arith.constant 0 : index
      %c0_64 = arith.constant 0 : index
      %c0_65 = arith.constant 0 : index
      %101 = vector.load %arg16[%c0_63, %c0_64, %c0_65] : memref<2x8x64xf32, #tpu.memory_space<vmem>>, vector<1x8x64xf32>
      %102 = vector.shape_cast %101 : vector<1x8x64xf32> to vector<8x64xf32>
      %103 = tpu.concatenate %100, %102 in 1 : vector<8x64xf32>, vector<8x64xf32> -> vector<8x128xf32>
      %c0_66 = arith.constant 0 : index
      %c0_67 = arith.constant 0 : index
      %c0_68 = arith.constant 0 : index
      %104 = vector.load %arg14[%c0_66, %c0_67, %c0_68] : memref<2x8x128xf32, #tpu.memory_space<vmem>>, vector<1x8x128xf32>
      %105 = vector.shape_cast %104 : vector<1x8x128xf32> to vector<8x128xf32>
      %106 = vector.shape_cast %103 : vector<8x128xf32> to vector<1x8x128xf32>
      tpu.vector_store %arg14[%c0_66, %c0_67, %c0_68], %106 {strides = array<i32>} : memref<2x8x128xf32, #tpu.memory_space<vmem>>, vector<1x8x128xf32>,
      %c1_69 = arith.constant 1 : index
      %c0_70 = arith.constant 0 : index
      %c0_71 = arith.constant 0 : index
      %107 = vector.load %arg15[%c1_69, %c0_70, %c0_71] : memref<2x8x64xf32, #tpu.memory_space<vmem>>, vector<1x8x64xf32>
      %108 = vector.shape_cast %107 : vector<1x8x64xf32> to vector<8x64xf32>
      %c1_72 = arith.constant 1 : index
      %c0_73 = arith.constant 0 : index
      %c0_74 = arith.constant 0 : index
      %109 = vector.load %arg16[%c1_72, %c0_73, %c0_74] : memref<2x8x64xf32, #tpu.memory_space<vmem>>, vector<1x8x64xf32>
      %110 = vector.shape_cast %109 : vector<1x8x64xf32> to vector<8x64xf32>
      %111 = tpu.concatenate %108, %110 in 1 : vector<8x64xf32>, vector<8x64xf32> -> vector<8x128xf32>
      %c1_75 = arith.constant 1 : index
      %c0_76 = arith.constant 0 : index
      %c0_77 = arith.constant 0 : index
      %112 = vector.load %arg14[%c1_75, %c0_76, %c0_77] : memref<2x8x128xf32, #tpu.memory_space<vmem>>, vector<1x8x128xf32>
      %113 = vector.shape_cast %112 : vector<1x8x128xf32> to vector<8x128xf32>
      %114 = vector.shape_cast %111 : vector<8x128xf32> to vector<1x8x128xf32>
      tpu.vector_store %arg14[%c1_75, %c0_76, %c0_77], %114 {strides = array<i32>} : memref<2x8x128xf32, #tpu.memory_space<vmem>>, vector<1x8x128xf32>,
    } else {
    }
    return
  }
  func.func @transform_0(%arg0: i32) -> (i32, i32, i32) {
    %c0_i32 = arith.constant 0 : i32
    %c0_i32_0 = arith.constant 0 : i32
    %c0_i32_1 = arith.constant 0 : i32
    return %arg0, %c0_i32, %c0_i32_0 : i32, i32, i32
  }
  func.func @transform_1(%arg0: i32) -> (i32, i32) {
    %c0_i32 = arith.constant 0 : i32
    %c0_i32_0 = arith.constant 0 : i32
    %c0_i32_1 = arith.constant 0 : i32
    return %c0_i32, %c0_i32_0 : i32, i32
  }
  func.func @transform_2(%arg0: i32) -> (i32, i32, i32) {
    %c0_i32 = arith.constant 0 : i32
    %c0_i32_0 = arith.constant 0 : i32
    %c0_i32_1 = arith.constant 0 : i32
    %c0_i32_2 = arith.constant 0 : i32
    return %c0_i32, %c0_i32_0, %c0_i32_1 : i32, i32, i32
  }
  func.func @transform_3(%arg0: i32) -> (i32, i32, i32) {
    %c0_i32 = arith.constant 0 : i32
    %c0_i32_0 = arith.constant 0 : i32
    %c0_i32_1 = arith.constant 0 : i32
    %c0_i32_2 = arith.constant 0 : i32
    return %c0_i32, %c0_i32_0, %c0_i32_1 : i32, i32, i32
  }
  func.func @transform_4(%arg0: i32) -> (i32, i32) {
    %c0_i32 = arith.constant 0 : i32
    %c0_i32_0 = arith.constant 0 : i32
    %c0_i32_1 = arith.constant 0 : i32
    return %c0_i32, %c0_i32_0 : i32, i32
  }
  func.func @transform_5(%arg0: i32) -> (i32, i32) {
    %c0_i32 = arith.constant 0 : i32
    %c0_i32_0 = arith.constant 0 : i32
    %c0_i32_1 = arith.constant 0 : i32
    return %c0_i32, %c0_i32_0 : i32, i32
  }
  func.func @transform_6(%arg0: i32) -> (i32, i32) {
    %c0_i32 = arith.constant 0 : i32
    %c0_i32_0 = arith.constant 0 : i32
    %c0_i32_1 = arith.constant 0 : i32
    return %c0_i32, %c0_i32_0 : i32, i32
  }
  func.func @transform_7(%arg0: i32) -> (i32, i32) {
    %c0_i32 = arith.constant 0 : i32
    %c0_i32_0 = arith.constant 0 : i32
    %c0_i32_1 = arith.constant 0 : i32
    return %c0_i32, %c0_i32_0 : i32, i32
  }
  func.func @transform_8(%arg0: i32) -> (i32, i32) {
    %c0_i32 = arith.constant 0 : i32
    %c0_i32_0 = arith.constant 0 : i32
    %c0_i32_1 = arith.constant 0 : i32
    return %c0_i32, %c0_i32_0 : i32, i32
  }
  func.func @transform_9(%arg0: i32) -> (i32, i32) {
    %c0_i32 = arith.constant 0 : i32
    %c0_i32_0 = arith.constant 0 : i32
    %c0_i32_1 = arith.constant 0 : i32
    return %c0_i32, %c0_i32_0 : i32, i32
  }
  func.func @transform_10(%arg0: i32) -> (i32, i32) {
    %c0_i32 = arith.constant 0 : i32
    %c0_i32_0 = arith.constant 0 : i32
    %c0_i32_1 = arith.constant 0 : i32
    return %c0_i32, %c0_i32_0 : i32, i32
  }
  func.func @transform_11(%arg0: i32) -> (i32, i32) {
    %c0_i32 = arith.constant 0 : i32
    %c0_i32_0 = arith.constant 0 : i32
    %c0_i32_1 = arith.constant 0 : i32
    return %c0_i32, %c0_i32_0 : i32, i32
  }
  func.func @transform_12(%arg0: i32) -> (i32, i32, i32) {
    %c0_i32 = arith.constant 0 : i32
    %c0_i32_0 = arith.constant 0 : i32
    %c0_i32_1 = arith.constant 0 : i32
    return %arg0, %c0_i32, %c0_i32_0 : i32, i32, i32
  }
  func.func @transform_13(%arg0: i32) -> (i32, i32, i32) {
    %c0_i32 = arith.constant 0 : i32
    %c0_i32_0 = arith.constant 0 : i32
    %c0_i32_1 = arith.constant 0 : i32
    %c0_i32_2 = arith.constant 0 : i32
    return %c0_i32, %c0_i32_0, %c0_i32_1 : i32, i32, i32
  }
}

</mosaic_0001>

<bundles_post_ra>
// kernel: decoder_forward.1
= control target key start
LH: loop header
LB: loop body
LE: loop exit
PB: predicated region body
PF: predicated region fallthrough
CT: control target
= control target key end

     0   :  { %19 = vsyncpa [#allocation5], 0  ;;  %s1381_s0 = inlined_call_operand.vmem [shape: s32[1,8,1], index: 0, kind: input, shape index: {}]   ;;  %s1382_s1 = inlined_call_operand.vmem [shape: bf16[48,32], index: 1, kind: input, shape index: {}]   ;;  %s1383_s2 = inlined_call_operand.vmem [shape: f32[2,8,64], index: 2, kind: input, shape index: {}]   ;;  %s1384_s3 = inlined_call_operand.hbm [shape: f32[2,8,64], index: 3, kind: input, shape index: {}]   ;;  %s1385_s4 = inlined_call_operand.hbm [shape: bf16[32,256], index: 4, kind: input, shape index: {}]   ;;  %s1386_s5 = inlined_call_operand.vmem [shape: bf16[64,256], index: 5, kind: input, shape index: {}]   ;;  %s1387_s6 = inlined_call_operand.vmem [shape: f32[1,256], index: 6, kind: input, shape index: {}]   ;;  %s1388_s7 = inlined_call_operand.hbm [shape: bf16[64,256], index: 7, kind: input, shape index: {}]   ;;  %s1389_s8 = inlined_call_operand.hbm [shape: bf16[64,256], index: 8, kind: input, shape index: {}]   ;;  %s1390_s9 = inlined_call_operand.hbm [shape: f32[1,256], index: 9, kind: input, shape index: {}]   ;;  %s1391_s10 = inlined_call_operand.hbm [shape: bf16[64,128], index: 10, kind: input, shape index: {}]   ;;  %s1392_s11 = inlined_call_operand.vmem [shape: f32[1,128], index: 11, kind: input, shape index: {}]   ;;  %s1393_s12 = inlined_call_operand.vmem [shape: f32[1,8,128], index: 12, kind: output, shape index: {0}]   ;;  %s1394_s13 = inlined_call_operand.vmem [shape: f32[2,8,128], index: 13, kind: output, shape index: {1}]  }
   0x1   :  { %20 = vsyncpa [#allocation7], 0 }
   0x2   :  { %21 = vsyncpa [#allocation10], 0 }
   0x3   :  { %22 = vsyncpa [#allocation13], 0  ;;  %s1079_s25 = smov [#allocation6]   ;;  %s1080_s27 = smov [#allocation9]  }
   0x4   :  { %s46_s26 = sshll.u32 %s1079_s25, 4  ;;  %s74_s28 = sshll.u32 %s1080_s27, 4  ;;  %s47_s26 = int_to_ptr.vmem [resolvable:$true] %s46_s26  ;;  %s1162_s28 = int_to_ptr.vmem [resolvable:$true] %s74_s28 }
   0x5   :  { %s939_s14 = scalar_lea.hbm %s1385_s4, 512 }
   0x6   :  { %p940_p0 = scmp.ne.s32.totalorder %s1385_s4, %s939_s14  ;;  %p943_p1 = scmp.lt.u32.totalorder %s939_s14, %s1385_s4 }
   0x8   :  { %p945_p2 = pnand %p943_p1, %p940_p0 }
   0xa   :  { %948 = shalt.err (!%p945_p2)
}
   0xb   :  { %s949_s19 = scalar_lea.vmem %s47_s26, 512  ;;  %p954_p4 = scmp.lt.s32.totalorder %s47_s26, %s47_s26 }
   0xc   :  { %p950_p3 = scmp.ne.s32.totalorder %s47_s26, %s949_s19  ;;  %p955_p5 = scmp.lt.s32.totalorder %s949_s19, %s949_s19 }
   0xe   :  { %p956_p6 = por %p955_p5, %p954_p4 }
  0x10   :  { %p957_p7 = pnand %p956_p6, %p950_p3 }
  0x12   :  { %960 = shalt.err (!%p957_p7)
}
  0x13   :  { %s1081_s20 = smov 128   ;;  %s1082_s21 = smov 8  }
  0x14   :  { %52 = dma.hbm_to_vmem [thread:$0]  %s1385_s4, 512, %s47_s26, [#allocation7], %s1081_s20, %s1081_s20, %s1082_s21  }
  0x15   :  { %s961_s27 = scalar_lea.hbm %s1389_s8, 1024 }
  0x16   :  { %p962_p8 = scmp.ne.s32.totalorder %s1389_s8, %s961_s27  ;;  %p965_p9 = scmp.lt.u32.totalorder %s961_s27, %s1389_s8 }
  0x18   :  { %p967_p10 = pnand %p965_p9, %p962_p8 }
  0x1a   :  { %970 = shalt.err (!%p967_p10)
}
  0x1b   :  { %s971_s16 = scalar_lea.vmem %s1162_s28, 1024  ;;  %p976_p12 = scmp.lt.s32.totalorder %s1162_s28, %s1162_s28 }
  0x1c   :  { %p972_p11 = scmp.ne.s32.totalorder %s1162_s28, %s971_s16  ;;  %p977_p13 = scmp.lt.s32.totalorder %s971_s16, %s971_s16 }
  0x1e   :  { %p978_p0 = por %p977_p13, %p976_p12 }
  0x20   :  { %p979_p1 = pnand %p978_p0, %p972_p11 }
  0x22   :  { %982 = shalt.err (!%p979_p1)
}
  0x23   :  { %80 = dma.hbm_to_vmem [thread:$0]  %s1389_s8, 1024, %s1162_s28, [#allocation10], %s1081_s20, %s1081_s20, %s1082_s21  }
  0x24   :  { %s1083_s17 = smov [#allocation4]   ;;  %s1084_s19 = smov [#allocation8]  }
  0x25   :  { %s34_s18 = sshll.u32 %s1083_s17, 4  ;;  %s62_s22 = sshll.u32 %s1084_s19, 4  ;;  %s35_s18 = int_to_ptr.vmem [resolvable:$true] %s34_s18  ;;  %s1199_s22 = int_to_ptr.vmem [resolvable:$true] %s62_s22 }
  0x26   :  { %s983_s25 = scalar_lea.hbm %s1384_s3, 256 }
  0x27   :  { %p984_p2 = scmp.ne.s32.totalorder %s1384_s3, %s983_s25  ;;  %p987_p3 = scmp.lt.u32.totalorder %s983_s25, %s1384_s3 }
  0x29   :  { %p989_p4 = pnand %p987_p3, %p984_p2 }
  0x2b   :  { %992 = shalt.err (!%p989_p4)
}
  0x2c   :  { %s993_s8 = scalar_lea.vmem %s35_s18, 256  ;;  %p998_p6 = scmp.lt.s32.totalorder %s35_s18, %s35_s18 }
  0x2d   :  { %p994_p5 = scmp.ne.s32.totalorder %s35_s18, %s993_s8  ;;  %p999_p7 = scmp.lt.s32.totalorder %s993_s8, %s993_s8 }
  0x2f   :  { %p1000_p8 = por %p999_p7, %p998_p6 }
  0x31   :  { %p1001_p9 = pnand %p1000_p8, %p994_p5 }
  0x33   :  { %1004 = shalt.err (!%p1001_p9)
}
  0x34   :  { %40 = dma.hbm_to_vmem [thread:$0]  %s1384_s3, 256, %s35_s18, [#allocation5], %s1081_s20, %s1081_s20, %s1082_s21  }
  0x35   :  { %s1005_s26 = scalar_lea.hbm %s1388_s7, 1024 }
  0x36   :  { %p1006_p10 = scmp.ne.s32.totalorder %s1388_s7, %s1005_s26  ;;  %p1009_p11 = scmp.lt.u32.totalorder %s1005_s26, %s1388_s7 }
  0x38   :  { %p1011_p12 = pnand %p1009_p11, %p1006_p10 }
  0x3a   :  { %1014 = shalt.err (!%p1011_p12)
}
  0x3b   :  { %s1015_s25 = scalar_lea.vmem %s1199_s22, 1024  ;;  %p1020_p0 = scmp.lt.s32.totalorder %s1199_s22, %s1199_s22 }
  0x3c   :  { %p1016_p13 = scmp.ne.s32.totalorder %s1199_s22, %s1015_s25  ;;  %p1021_p1 = scmp.lt.s32.totalorder %s1015_s25, %s1015_s25 }
  0x3e   :  { %p1022_p2 = por %p1021_p1, %p1020_p0 }
  0x40   :  { %p1023_p3 = pnand %p1022_p2, %p1016_p13 }
  0x42   :  { %1026 = shalt.err (!%p1023_p3)
}
  0x43   :  { %68 = dma.hbm_to_vmem [thread:$0]  %s1388_s7, 1024, %s1199_s22, [#allocation7], %s1081_s20, %s1081_s20, %s1082_s21  }
  0x44   :  { %s1085_s27 = smov [#allocation11]   ;;  %s1086_s30 = smov [#allocation12]  }
  0x45   :  { %s87_s29 = sshll.u32 %s1085_s27, 4  ;;  %s96_s14 = sshll.u32 %s1086_s30, 4  ;;  %s88_s29 = int_to_ptr.vmem [resolvable:$true] %s87_s29  ;;  %s1236_s14 = int_to_ptr.vmem [resolvable:$true] %s96_s14 }
  0x46   :  { %s1027_s15 = scalar_lea.hbm %s1390_s9, 32 }
  0x47   :  { %p1028_p4 = scmp.ne.s32.totalorder %s1390_s9, %s1027_s15  ;;  %p1031_p5 = scmp.lt.u32.totalorder %s1027_s15, %s1390_s9 }
  0x49   :  { %p1033_p6 = pnand %p1031_p5, %p1028_p4 }
  0x4b   :  { %1036 = shalt.err (!%p1033_p6)
}
  0x4c   :  { %s1037_s7 = scalar_lea.vmem %s88_s29, 32  ;;  %p1042_p8 = scmp.lt.s32.totalorder %s88_s29, %s88_s29 }
  0x4d   :  { %p1038_p7 = scmp.ne.s32.totalorder %s88_s29, %s1037_s7  ;;  %p1043_p9 = scmp.lt.s32.totalorder %s1037_s7, %s1037_s7 }
  0x4f   :  { %p1044_p10 = por %p1043_p9, %p1042_p8 }
  0x51   :  { %p1045_p11 = pnand %p1044_p10, %p1038_p7 }
  0x53   :  { %1048 = shalt.err (!%p1045_p11)
}
  0x54   :  { %90 = dma.hbm_to_vmem [thread:$0]  %s1390_s9, 32, %s88_s29, [#allocation10]  }
  0x55   :  { %s1049_s23 = scalar_lea.hbm %s1391_s10, 512 }
  0x56   :  { %p1050_p12 = scmp.ne.s32.totalorder %s1391_s10, %s1049_s23  ;;  %p1053_p13 = scmp.lt.u32.totalorder %s1049_s23, %s1391_s10 }
  0x58   :  { %p1055_p0 = pnand %p1053_p13, %p1050_p12 }
  0x5a   :  { %1058 = shalt.err (!%p1055_p0)
}
  0x5b   :  { %s1059_s27 = scalar_lea.vmem %s1236_s14, 512  ;;  %p1064_p2 = scmp.lt.s32.totalorder %s1236_s14, %s1236_s14 }
  0x5c   :  { %p1060_p1 = scmp.ne.s32.totalorder %s1236_s14, %s1059_s27  ;;  %p1065_p3 = scmp.lt.s32.totalorder %s1059_s27, %s1059_s27 }
  0x5e   :  { %p1066_p4 = por %p1065_p3, %p1064_p2 }
  0x60   :  { %p1067_p5 = pnand %p1066_p4, %p1060_p1 }
  0x62   :  { %1070 = shalt.err (!%p1067_p5)
}
  0x63   :  { %s1087_s9 = smov 64   ;;  %s1088_s29 = smov 4  }
  0x64   :  { %102 = dma.hbm_to_vmem [thread:$0]  %s1391_s10, 512, %s1236_s14, [#allocation13], %s1087_s9, %s1087_s9, %s1088_s29  }
  0x65   :  { %1071 = dma.done.wait [#allocation5], 256  }
  0x66   :  { %1072 = vsyncadd [#allocation5], 4294967040 }
  0x67   :  { %1073 = dma.done.wait [#allocation7], 1536  }
  0x68   :  { %1074 = vsyncadd [#allocation7], 4294965760 }
  0x69   :  { %1075 = dma.done.wait [#allocation10], 1056  }
  0x6a   :  { %1076 = vsyncadd [#allocation10], 4294966240 }
  0x6b   :  { %1077 = dma.done.wait [#allocation13], 512  }
  0x6c   :  { %1078 = vsyncadd [#allocation13], 4294966784  ;;  %v1089_v0 = vmov 0   ;;  %v1090_v1 = vmov 0.0   ;;  %v137_v2 = vld [vmem:[%s1381_s0] sm:$0xff]  ;;  %v875_v4 = vld [vmem:[%s1382_s1 + $0x8] sm:$0xff]   ;;  %v138_v15 = vlaneseq }
  0x6d   :  { %873 = vset.pattern.permute.xlu0 %v1089_v0  ;;  %838 = vmatprep.subr.bf16.mxu0 %v1090_v1  ;;  %v874_v3 = vld [vmem:[%s1382_s1] sm:$0xff]   ;;  %vm1091_vm0 = vmmov 0   ;;  %v880_v7 = vld [vmem:[%s1386_s5 + $0x14] ss:$8 sps:$4 sm:$0xff]   ;;  %v882_v9 = vld [vmem:[%s1386_s5 + $0x10] ss:$8 sps:$4 sm:$0xff]  }
  0x6e   :  { %308 = vmatprep.mubr.bf16.mxu1 %v1089_v0  ;;  %141 = vperm.xlu0 %873, %v137_v2   ;;  %v877_v5 = vld [vmem:[%s1386_s5 + $0x4] ss:$8 sps:$4 sm:$0xff]   ;;  %v879_v6 = vld [vmem:[%s1386_s5] ss:$8 sps:$4 sm:$0xff]   ;;  %v876_v8 = vld [vmem:[%s1382_s1 + $0x10] sm:$0xff]   ;;  %v139_v16 = vand.u32 127, %v138_v15 }
  0x6f   :  { %839 = vmatpush3.bf16.msra.mxu0 %v874_v3  ;;  %844 = vmatprep.mubr.msk.bf16.mxu0 %vm1091_vm0, %v1090_v1  ;;  %v888_v10 = vld [vmem:[#allocation6 + $0x4] ss:$8 sps:$4 sm:$0xff]   ;;  %v883_v11 = vld [vmem:[%s1386_s5 + $0x24] ss:$8 sps:$4 sm:$0xff]   ;;  %v885_v12 = vld [vmem:[%s1386_s5 + $0x20] ss:$8 sps:$4 sm:$0xff]  }
  0x70   :  { %840 = vmatprep.subr.bf16.mxu0 %v1090_v1  ;;  %276 = vmatprep.subr.bf16.mxu1 %v877_v5  ;;  %v889_v13 = vld [vmem:[%s1386_s5 + $0x34] ss:$8 sps:$4 sm:$0xff]   ;;  %v891_v14 = vld [vmem:[%s1386_s5 + $0x30] ss:$8 sps:$4 sm:$0xff]   ;;  %vm171_vm2 = vcmask 392192   ;;  %v128_v23 = vld [vmem:[%s1383_s2] sm:$0xff] }
  0x71   :  { %277 = vmatpush1.bf16.msra.mxu1 %v879_v6  ;;  %v886_v19 = vld [vmem:[#allocation6] ss:$8 sps:$4 sm:$0xff]   ;;  %v894_v21 = vld [vmem:[#allocation6 + $0x14] ss:$8 sps:$4 sm:$0xff]   ;;  %v892_v22 = vld [vmem:[#allocation6 + $0x10] ss:$8 sps:$4 sm:$0xff]  }
  0x72   :  { %278 = vmatprep.subr.bf16.mxu1 %v880_v7  ;;  %vm130_vm3 = vcmask 523264   ;;  %v133_v26 = vld [vmem:[#allocation4] sm:$0xff]  ;;  %vm337_vm4 = vcmask 261120   ;;  %v1323_v37 = vshrl.u32 %v138_v15, 7  ;;  %v895_v57 = vld [vmem:[#allocation9] ss:$8 sps:$4 sm:$0xff]  }
  0x73   :  { %841 = vmatpush3.bf16.msra.mxu0 %v875_v4  ;;  %131 = vst.msk [vmem:[#allocation2] sm:$0xff] %vm130_vm3, %v128_v23  ;;  %135 = vst.msk [vmem:[#allocation3] sm:$0xff] %vm130_vm3, %v133_v26  ;;  %v227_v39 = vld [vmem:[%s1387_s6] sm:$0x3]  ;;  %v897_v58 = vld [vmem:[#allocation9 + $0x4] ss:$8 sps:$4 sm:$0xff]  }
  0x74   :  { %842 = vmatprep.subr.bf16.mxu0 %v1090_v1  ;;  %v385_v38 = vsub.s32 0, %v1323_v37  ;;  %v389_v41 = vsub.s32 1, %v1323_v37  ;;  %v898_v59 = vld [vmem:[#allocation8] ss:$8 sps:$4 sm:$0xff]   ;;  %v900_v60 = vld [vmem:[#allocation8 + $0x4] ss:$8 sps:$4 sm:$0xff]  }
  0x75   :  { %279 = vmatpush1.bf16.msra.mxu1 %v882_v9  ;;  %v903_v61 = vld [vmem:[#allocation9 + $0x14] ss:$8 sps:$4 sm:$0xff]   ;;  %v901_v63 = vld [vmem:[#allocation9 + $0x10] ss:$8 sps:$4 sm:$0xff]   ;;  %v909_v2 = vld [vmem:[#allocation9 + $0x24] ss:$8 sps:$4 sm:$0xff]  }
  0x76   :  { %280 = vmatprep.subr.bf16.mxu1 %v883_v11  ;;  %v386_v40 = vrot.slane %v227_v39, %v385_v38  ;;  %v390_v48 = vrot.slane %v227_v39, %v389_v41  ;;  %v906_v62 = vld [vmem:[#allocation8 + $0x14] ss:$8 sps:$4 sm:$0xff]   ;;  %v912_v3 = vld [vmem:[#allocation8 + $0x24] ss:$8 sps:$4 sm:$0xff]   ;;  %v907_v5 = vld [vmem:[#allocation9 + $0x20] ss:$8 sps:$4 sm:$0xff]  }
  0x77   :  { %843 = vmatpush3.bf16.msra.mxu0 %v876_v8  ;;  %v129_v4 = vld [vmem:[%s1383_s2 + $0x8] sm:$0xff]  ;;  %v910_v6 = vld [vmem:[#allocation8 + $0x20] ss:$8 sps:$4 sm:$0xff]  }
  0x78   :  { %341 = vmatprep.subr.bf16.mxu0 %v888_v10  ;;  %132 = vst.msk [vmem:[#allocation2 + $0x8] sm:$0xff] %vm130_vm3, %v129_v4  ;;  %v915_v7 = vld [vmem:[#allocation9 + $0x34] ss:$8 sps:$4 sm:$0xff]   ;;  %v913_v9 = vld [vmem:[#allocation9 + $0x30] ss:$8 sps:$4 sm:$0xff]  }
  0x79   :  { %281 = vmatpush1.bf16.msra.mxu1 %v885_v12  ;;  %v918_v8 = vld [vmem:[#allocation8 + $0x34] ss:$8 sps:$4 sm:$0xff]   ;;  %v916_v10 = vld [vmem:[#allocation8 + $0x30] ss:$8 sps:$4 sm:$0xff]  }
  0x7a   :  { %282 = vmatprep.subr.bf16.mxu1 %v889_v13  ;;  %v228_v24 = vld [vmem:[#allocation2] sm:$0xff]  ;;  %v229_v27 = vld [vmem:[#allocation3] sm:$0xff] }
  0x7b   :  { %v231_v25 = vpack.c.bf16 %v228_v24, %v228_v24  ;;  %405 = vrot.lane.b32.xlu0 %v229_v27, %s1087_s9  ;;  %v920_v37 = vld [vmem:[#allocation12 + $0x8] sm:$0xff]  }
  0x7d   :  { %283 = vmatpush1.bf16.msra.mxu1 %v891_v14 }
  0x7e   :  { %493 = vmatprep.subr.bf16.mxu1 %v897_v58 }
  0x7f   :  { %v445_v11 = vld [vmem:[#allocation2 + $0x8] sm:$0xff] }
  0x80   :  { %798 = vmatmul.mubr.msk.bf16.vlgmr.msra.gmra.mrb[0].mxu1 %vm130_vm3, %v231_v25  ;;  %v449_v12 = vpack.c.bf16 %v445_v11, %v445_v11 }
  0x81   :  { %525 = vmatprep.mubr.bf16.mxu1 %v1089_v0  ;;  %494 = vmatpush1.bf16.msra.mxu1 %v895_v57 }
  0x82   :  { %495 = vmatprep.subr.bf16.mxu1 %v903_v61 }
  0x85   :  { %496 = vmatpush1.bf16.msra.mxu1 %v901_v63 }
  0x86   :  { %497 = vmatprep.subr.bf16.mxu1 %v909_v2 }
  0x89   :  { %498 = vmatpush1.bf16.msra.mxu1 %v907_v5 }
  0x8a   :  { %499 = vmatprep.subr.bf16.mxu1 %v915_v7 }
  0x8d   :  { %500 = vmatpush1.bf16.msra.mxu1 %v913_v9 }
  0x8e   :  { %848 = vmatprep.subr.bf16.mxu1 %v1090_v1 }
  0x90   :  { %812 = vmatmul.mubr.msk.bf16.vlgmr.msra.gmra.mrb[4].mxu1 %vm130_vm3, %v449_v12  ;;  %v822_v12 = vld [vmem:[%s1392_s11] ss:$0 sm:$0xff] }
  0x91   :  { %856 = vmatprep.mubr.msk.bf16.mxu1 %vm1091_vm0, %v1090_v1 }
  0xed   :  { %v142_v17 = vpop.permute.xlu0 %141 }
  0xee   :  { %vm143_vm1 = vcmp.eq.s32.totalorder %v142_v17, %v139_v16 }
  0xef   :  { %v785_v18 = vsel %vm143_vm1, 1.0, %v1090_v1 }
  0xf0   :  { %v146_v20 = vpack.c.bf16 %v785_v18, %v785_v18 }
  0xf1   :  { %v406_v14 = vpop.permute.xlu0 %405 }
  0xf2   :  { %845 = vmatmul.mubr.msk.bf16.vlgmr.msra.gmra.mrb[0].mxu0 %vm171_vm2, %v146_v20 }
  0xf3   :  { %342 = vmatpush1.bf16.msra.mxu0 %v886_v19  ;;  %373 = vmatprep.mubr.bf16.mxu0 %v1089_v0  ;;  %v134_v19 = vld [vmem:[#allocation4 + $0x8] sm:$0xff] }
  0xf4   :  { %343 = vmatprep.subr.bf16.mxu0 %v894_v21  ;;  %136 = vst.msk [vmem:[#allocation3 + $0x8] sm:$0xff] %vm130_vm3, %v134_v19 }
  0xf7   :  { %344 = vmatpush1.bf16.msra.mxu0 %v892_v22 }
  0xf8   :  { %580 = vmatprep.subr.bf16.mxu0 %v900_v60 }
  0xfb   :  { %v447_v23 = vld [vmem:[#allocation3 + $0x8] sm:$0xff] }
  0xfc   :  { %644 = vrot.lane.b32.xlu0 %v447_v23, %s1087_s9 }
 0x153   :  { %v310_v33 = vpop.f32.mrb[0].mxu1 }
 0x154   :  { %v312_v34 = vpop.f32.mrb[1].mxu1 }
 0x155   :  { %v314_v35 = vpop.f32.mrb[2].mxu1 }
 0x156   :  { %v315_v36 = vpop.f32.mrb[3].mxu1 }
 0x163   :  { %v527_v26 = vpop.f32.mrb[4].mxu1 }
 0x164   :  { %v529_v27 = vpop.f32.mrb[5].mxu1 }
 0x1c5   :  { %v209_v28 = vpop.f32.mrb[0].mxu0 }
 0x1c6   :  { %v230_v29 = vpack.c.bf16 %v209_v28, %v209_v28  ;;  %v846_v30 = vpop.f32.mrb[1].mxu0  ;;  %v531_v28 = vpop.f32.mrb[6].mxu1 }
 0x1c7   :  { %v212_v31 = vpop.f32.mrb[2].mxu0 }
 0x1c8   :  { %v847_v32 = vpop.f32.mrb[3].mxu0  ;;  %803 = vmatmul.mubr.msk.bf16.vlgmr.msra.gmra.mrb[4].mxu0 %vm337_vm4, %v230_v29  ;;  %v532_v29 = vpop.f32.mrb[7].mxu1  ;;  %v443_v31 = vld [vmem:[#allocation11] sm:$0x3] }
 0x1c9   :  { %612 = vmatprep.mubr.bf16.mxu0 %v1089_v0  ;;  %581 = vmatpush1.bf16.msra.mxu0 %v898_v59  ;;  %v904_v0 = vld [vmem:[#allocation8 + $0x10] ss:$8 sps:$4 sm:$0xff]   ;;  %v625_v32 = vrot.slane %v443_v31, %v385_v38  ;;  %v919_v38 = vld [vmem:[#allocation12] sm:$0xff]  }
 0x1ca   :  { %582 = vmatprep.subr.bf16.mxu0 %v906_v62  ;;  %849 = vmatpush3.bf16.msra.mxu1 %v919_v38 }
 0x1cb   :  { %850 = vmatprep.subr.bf16.mxu1 %v1090_v1 }
 0x1cd   :  { %583 = vmatpush1.bf16.msra.mxu0 %v904_v0 }
 0x1ce   :  { %584 = vmatprep.subr.bf16.mxu0 %v912_v3  ;;  %851 = vmatpush3.bf16.msra.mxu1 %v920_v37 }
 0x1cf   :  { %852 = vmatprep.subr.bf16.mxu1 %v1090_v1 }
 0x1d1   :  { %585 = vmatpush1.bf16.msra.mxu0 %v910_v6 }
 0x1d2   :  { %586 = vmatprep.subr.bf16.mxu0 %v918_v8 }
 0x1d5   :  { %587 = vmatpush1.bf16.msra.mxu0 %v916_v10 }
 0x29b   :  { %v375_v42 = vpop.f32.mrb[4].mxu0 }
 0x29c   :  { %v376_v43 = vadd.f32 %v375_v42, %v310_v33  ;;  %v377_v44 = vpop.f32.mrb[5].mxu0  ;;  %v629_v42 = vrot.slane %v443_v31, %v389_v41  ;;  %v921_v41 = vld [vmem:[#allocation12 + $0x10] sm:$0xff]  }
 0x29d   :  { %v378_v45 = vadd.f32 %v377_v44, %v312_v34  ;;  %v379_v46 = vpop.f32.mrb[6].mxu0  ;;  %853 = vmatpush3.bf16.msra.mxu1 %v921_v41 }
 0x29e   :  { %v393_v47 = vadd.f32 %v386_v40, %v376_v43  ;;  %v380_v49 = vpop.f32.mrb[7].mxu0  ;;  %854 = vmatprep.subr.bf16.mxu1 %v1090_v1 }
 0x29f   :  { %v394_v51 = vadd.f32 %v390_v48, %v378_v45 }
 0x2a0   :  { %v395_v50 = vmul.f32 0.5, %v393_v47 }
 0x2a1   :  { %v396_v13 = vmul.f32 0.5, %v394_v51 }
 0x2a2   :  { %923 = vtanh.f32 %v395_v50 }
 0x2a3   :  { %925 = vtanh.f32 %v394_v51 }
 0x2a4   :  { %927 = vtanh.f32 %v396_v13 }
 0x2ac   :  { %v924_v52 = vpop.eup %923 }
 0x2ad   :  { %v399_v53 = vadd.f32 1.0, %v924_v52  ;;  %v926_v55 = vpop.eup %925  ;;  %v645_v52 = vpop.permute.xlu0 %644 }
 0x2ae   :  { %v928_v18 = vpop.eup %927 }
 0x2af   :  { %v401_v54 = vmul.f32 0.5, %v399_v53  ;;  %v400_v20 = vadd.f32 1.0, %v928_v18 }
 0x2b1   :  { %v409_v56 = vmul.f32 %v926_v55, %v401_v54  ;;  %v408_v15 = vmul.f32 %v406_v14, %v401_v54  ;;  %v402_v21 = vmul.f32 0.5, %v400_v20  ;;  %v922_v55 = vld [vmem:[#allocation12 + $0x18] sm:$0xff]  }
 0x2b2   :  { %855 = vmatpush3.bf16.msra.mxu1 %v922_v55 }
 0x2b3   :  { %411 = vrot.lane.b32.xlu1 %v409_v56, %s1087_s9 }
 0x325   :  { %v412_v16 = vpop.permute.xlu1 %411 }
 0x326   :  { %v414_v17 = vadd.f32 %v412_v16, %v408_v15 }
 0x328   :  { %929 = vtanh.f32 %v414_v17 }
 0x332   :  { %v930_v22 = vpop.eup %929 }
 0x333   :  { %v416_v24 = vmul.f32 %v930_v22, %v402_v21 }
 0x335   :  { %v448_v25 = vpack.c.bf16 %v416_v24, %v416_v24 }
 0x337   :  { %535 = vrot.lane.b32.xlu1 %v448_v25, %s1087_s9 }
 0x3a9   :  { %v536_v30 = vpop.permute.xlu1 %535 }
 0x3aa   :  { %821 = vmatmul.mubr.msk.bf16.vlgmr.msra.gmra.mrb[8].mxu0 %vm130_vm3, %v536_v30 }
 0x47d   :  { %v614_v33 = vpop.f32.mrb[8].mxu0 }
 0x47e   :  { %v615_v34 = vadd.f32 %v614_v33, %v527_v26  ;;  %v616_v35 = vpop.f32.mrb[9].mxu0 }
 0x47f   :  { %v617_v36 = vadd.f32 %v616_v35, %v529_v27  ;;  %v618_v39 = vpop.f32.mrb[10].mxu0 }
 0x480   :  { %v632_v40 = vadd.f32 %v625_v32, %v615_v34  ;;  %v619_v43 = vpop.f32.mrb[11].mxu0 }
 0x481   :  { %v633_v45 = vadd.f32 %v629_v42, %v617_v36 }
 0x482   :  { %v634_v44 = vmul.f32 0.5, %v632_v40 }
 0x483   :  { %v635_v51 = vmul.f32 0.5, %v633_v45 }
 0x484   :  { %931 = vtanh.f32 %v634_v44 }
 0x485   :  { %933 = vtanh.f32 %v633_v45 }
 0x486   :  { %935 = vtanh.f32 %v635_v51 }
 0x48e   :  { %v932_v46 = vpop.eup %931 }
 0x48f   :  { %v638_v47 = vadd.f32 1.0, %v932_v46  ;;  %v934_v49 = vpop.eup %933 }
 0x490   :  { %v936_v58 = vpop.eup %935 }
 0x491   :  { %v640_v48 = vmul.f32 0.5, %v638_v47  ;;  %v639_v60 = vadd.f32 1.0, %v936_v58 }
 0x493   :  { %v648_v50 = vmul.f32 %v934_v49, %v640_v48  ;;  %v647_v53 = vmul.f32 %v645_v52, %v640_v48  ;;  %v641_v62 = vmul.f32 0.5, %v639_v60 }
 0x495   :  { %650 = vrot.lane.b32.xlu1 %v648_v50, %s1087_s9 }
 0x499   :  { %423 = vrot.lane.b32.xlu1 %v414_v17, %s1087_s9 }
 0x49d   :  { %418 = vrot.lane.b32.xlu1 %v416_v24, %s1087_s9 }
 0x507   :  { %v651_v54 = vpop.permute.xlu1 %650 }
 0x508   :  { %v653_v56 = vadd.f32 %v651_v54, %v647_v53 }
 0x50a   :  { %937 = vtanh.f32 %v653_v56 }
 0x50b   :  { %v424_v57 = vpop.permute.xlu1 %423 }
 0x50c   :  { %426 = vst.msk [vmem:[#allocation3] sm:$0xff] %vm130_vm3, %v424_v57 }
 0x50f   :  { %v419_v59 = vpop.permute.xlu1 %418 }
 0x510   :  { %421 = vst.msk [vmem:[#allocation2] sm:$0xff] %vm130_vm3, %v419_v59 }
 0x513   :  { %v757_v61 = vld [vmem:[#allocation3] sm:$0xff] }
 0x514   :  { %v938_v1 = vpop.eup %937  ;;  %759 = vrot.lane.b32.xlu1 %v757_v61, %s1087_s9 }
 0x515   :  { %v655_v63 = vmul.f32 %v938_v1, %v641_v62 }
 0x517   :  { %v666_v0 = vpack.c.bf16 %v655_v63, %v655_v63  ;;  %v756_v2 = vld [vmem:[#allocation2] sm:$0xff] }
 0x519   :  { %683 = vrot.lane.b32.xlu0 %v666_v0, %s1087_s9 }
 0x51d   :  { %662 = vrot.lane.b32.xlu0 %v653_v56, %s1087_s9 }
 0x521   :  { %657 = vrot.lane.b32.xlu0 %v655_v63, %s1087_s9 }
 0x586   :  { %v760_v3 = vpop.permute.xlu1 %759 }
 0x587   :  { %v762_v4 = vsel %vm130_vm3, %v756_v2, %v760_v3 }
 0x588   :  { %763 = vst [vmem:[%s1394_s13] sm:$0xff] %v762_v4 }
 0x58b   :  { %v684_v5 = vpop.permute.xlu0 %683 }
 0x58c   :  { %857 = vmatmul.mubr.msk.bf16.vlgmr.msra.gmra.mrb[8].mxu1 %vm130_vm3, %v684_v5 }
 0x58f   :  { %v663_v6 = vpop.permute.xlu0 %662 }
 0x590   :  { %665 = vst.msk [vmem:[#allocation3 + $0x8] sm:$0xff] %vm130_vm3, %v663_v6 }
 0x593   :  { %v658_v7 = vpop.permute.xlu0 %657 }
 0x594   :  { %660 = vst.msk [vmem:[#allocation2 + $0x8] sm:$0xff] %vm130_vm3, %v658_v7 }
 0x597   :  { %v765_v8 = vld [vmem:[#allocation3 + $0x8] sm:$0xff] }
 0x598   :  { %767 = vrot.lane.b32.xlu0 %v765_v8, %s1087_s9 }
 0x59b   :  { %v764_v9 = vld [vmem:[#allocation2 + $0x8] sm:$0xff] }
 0x60a   :  { %v768_v10 = vpop.permute.xlu0 %767 }
 0x60b   :  { %v770_v11 = vsel %vm130_vm3, %v764_v9, %v768_v10 }
 0x60c   :  { %828 = vst [vmem:[%s1394_s13 + $0x8] sm:$0xff] %v770_v11 }
 0x65f   :  { %v746_v13 = vpop.f32.mrb[8].mxu1 }
 0x660   :  { %v747_v14 = vadd.f32 %v822_v12, %v746_v13  ;;  %v858_v15 = vpop.f32.mrb[9].mxu1 }
 0x661   :  { %v749_v16 = vpop.f32.mrb[10].mxu1 }
 0x662   :  { %752 = vst [vmem:[%s1393_s12] sm:$0xff] %v747_v14  ;;  %v859_v17 = vpop.f32.mrb[11].mxu1 }
 0x663   :  { %781 = vsyncpa [#allocation5], 1 }
 0x664   :  { %782 = vsyncpa [#allocation7], 1 }
 0x665   :  { %783 = vsyncpa [#allocation10], 1 }
 0x666   :  { %784 = vsyncpa [#allocation13], 1 }

</bundles_post_ra>
